<compile_context>
chip_gen: v6e
topology: v6e:2x2x1
jax: 0.10.0
libtpu: 0.0.40
codegen_flags: <defaults>
</compile_context>

<pallas_src>
import functools

import jax
import jax.numpy as jnp
from jax.experimental import pallas as pl
from jax.experimental.pallas import tpu as pltpu

_LANE = 128
_SUBLANE = 8


def _silu(x):
    return x * jax.nn.sigmoid(x)


def _relu6(x):
    return jnp.clip(x, 0.0, 6.0)


def _gelu_tanh(x):
    c = jnp.float32(0.7978845608028654)  # sqrt(2/pi)
    return 0.5 * x * (1.0 + jnp.tanh(c * (x + 0.044715 * x * x * x)))


# DynamicEquationUnit.base_funcs; term i uses base_funcs[i % 7].
_BASE_FUNCS = (jnp.sin, jnp.cos, jnp.tanh, _silu, _relu6, _silu, _gelu_tanh)


def _round_up(n, m):
    return ((n + m - 1) // m) * m


# ------------------------------ fused kernel --------------------------------

def _deu_kernel(x_ref, w_in_ref, b_in_ref, gamma_ref, beta_ref,
                coeffs_ref, exps_ref, w_out_ref, b_out_ref, o_ref,
                *, inv_internal_dim, complexity):
    x = x_ref[...]                                                    # (TB, Din_pad)

    # input_layer: Linear(Din -> H).  Padded weight cols / bias lanes are 0,
    # so padded lanes of h are exactly 0.
    h = jnp.dot(x, w_in_ref[...], preferred_element_type=jnp.float32) + b_in_ref[...]

    # LayerNorm (eps=1e-5, biased variance) in ONE pass.  Padded lanes of h are
    # 0, so sums over the padded width equal sums over the real width; divide by
    # the real internal_dim.
    mu = jnp.sum(h, axis=-1, keepdims=True) * inv_internal_dim
    ex2 = jnp.sum(h * h, axis=-1, keepdims=True) * inv_internal_dim
    var = ex2 - mu * mu
    hn = (h - mu) * jax.lax.rsqrt(var + 1e-5)
    hn = hn * gamma_ref[...] + beta_ref[...]    # padded gamma/beta = 0 -> lanes stay 0
    hn = jnp.maximum(hn, 0.0)                   # ReLU

    # Dynamic-equation sum (complexity is a trace-time constant -> unrolled).
    coeffs = coeffs_ref[...]                    # (C, H_pad)
    exps = exps_ref[...]                        # (C, H_pad)
    dyn = jnp.zeros_like(hn)
    for i in range(complexity):
        func = _BASE_FUNCS[i % len(_BASE_FUNCS)]
        t = jnp.clip(hn * exps[i:i + 1, :], -10.0, 10.0)
        # nan_to_num elided: t in [-10, 10] and every base func is finite there,
        # so each term is provably finite (bit-exact match with the reference).
        dyn = dyn + coeffs[i:i + 1, :] * func(t)  # padded coeff lanes kill cos(0)=1

    # output_layer: Linear(H -> Dout) + clamp.
    out = jnp.dot(dyn, w_out_ref[...], preferred_element_type=jnp.float32) + b_out_ref[...]
    o_ref[...] = jnp.clip(out, -100.0, 100.0)


# ------------------------------ wrapper --------------------------------------

def make_forward(input_dim, output_dim, internal_dim, complexity=5):
    din_p = _round_up(input_dim, _LANE)
    dout_p = _round_up(output_dim, _LANE)

    kernel = functools.partial(
        _deu_kernel,
        inv_internal_dim=1.0 / float(internal_dim),
        complexity=complexity,
    )

    @jax.jit
    def forward(x, padded_params):
        (w_in, b_in, gamma, beta, coeffs_t, exps_t, w_out, b_out) = padded_params
        batch = x.shape[0]
        batch_p = _round_up(batch, _SUBLANE)
        tb = min(batch_p, 256)                   # batch tile (multiple of 8)
        batch_p = _round_up(batch_p, tb)
        x_pad = jnp.pad(x, ((0, batch_p - batch), (0, din_p - x.shape[1])))

        wmap = lambda i: (0, 0)                  # weights: same block every tile
        y_pad = pl.pallas_call(
            kernel,
            out_shape=jax.ShapeDtypeStruct((batch_p, dout_p), jnp.float32),
            grid=(batch_p // tb,),
            in_specs=[
                pl.BlockSpec((tb, din_p), lambda i: (i, 0)),
                pl.BlockSpec(w_in.shape, wmap),
                pl.BlockSpec(b_in.shape, wmap),
                pl.BlockSpec(gamma.shape, wmap),
                pl.BlockSpec(beta.shape, wmap),
                pl.BlockSpec(coeffs_t.shape, wmap),
                pl.BlockSpec(exps_t.shape, wmap),
                pl.BlockSpec(w_out.shape, wmap),
                pl.BlockSpec(b_out.shape, wmap),
            ],
            out_specs=pl.BlockSpec((tb, dout_p), lambda i: (i, 0)),
            compiler_params=pltpu.CompilerParams(
                dimension_semantics=("parallel",)),
        )(x_pad, w_in, b_in, gamma, beta, coeffs_t, exps_t, w_out, b_out)
        return y_pad[:batch, :output_dim]

    return forward


# ------------------------------ parameter init ------------------------------

def _xavier_uniform(key, shape):
    fan_in, fan_out = shape
    limit = (6.0 / (fan_in + fan_out)) ** 0.5
    return jax.random.uniform(key, shape, jnp.float32, -limit, limit)


def make_unit_params(key, input_dim, output_dim, complexity=5):
    """One DynamicEquationUnit.  Weights stored (in, out); coeffs/exps stored
    transposed as (complexity, internal_dim) so each term's row is lane-dense."""
    internal_dim = max(output_dim, complexity, input_dim // 2 + 1)
    k1, k2, k3, k4 = jax.random.split(key, 4)
    w_in = _xavier_uniform(k1, (input_dim, internal_dim))
    b_in = jnp.zeros((1, internal_dim), jnp.float32)
    gamma = jnp.ones((1, internal_dim), jnp.float32)
    beta = jnp.zeros((1, internal_dim), jnp.float32)
    coeffs_t = jax.random.normal(k2, (complexity, internal_dim), jnp.float32) * 0.05
    exps_t = jax.random.uniform(k3, (complexity, internal_dim), jnp.float32) * 1.5 + 0.25
    w_out = _xavier_uniform(k4, (internal_dim, output_dim))
    b_out = jnp.zeros((1, output_dim), jnp.float32)
    return internal_dim, (w_in, b_in, gamma, beta, coeffs_t, exps_t, w_out, b_out)


# ------------------------------ lane padding ---------------------------------

def _pad_to(a, shape):
    return jnp.pad(a, [(0, t - s) for s, t in zip(a.shape, shape)])


def pad_unit_params(params):
    """Zero-pad feature dims to 128 lanes.  gamma/beta/coeffs padded with ZEROS
    (not gamma's natural 1s) so padded activation lanes remain exactly 0."""
    w_in, b_in, gamma, beta, coeffs_t, exps_t, w_out, b_out = params
    din, h = w_in.shape
    dout = w_out.shape[1]
    din_p, h_p, dout_p = (_round_up(d, _LANE) for d in (din, h, dout))
    return (
        _pad_to(w_in, (din_p, h_p)),
        _pad_to(b_in, (1, h_p)),
        _pad_to(gamma, (1, h_p)),
        _pad_to(beta, (1, h_p)),
        _pad_to(coeffs_t, (coeffs_t.shape[0], h_p)),
        _pad_to(exps_t, (exps_t.shape[0], h_p)),
        _pad_to(w_out, (h_p, dout_p)),
        _pad_to(b_out, (1, dout_p)),
    )


# ------------------------------ pure-JAX reference ---------------------------

def reference_forward(x, params, complexity=5):
    w_in, b_in, gamma, beta, coeffs_t, exps_t, w_out, b_out = params
    h = x @ w_in + b_in
    mu = jnp.mean(h, axis=-1, keepdims=True)
    var = jnp.mean((h - mu) ** 2, axis=-1, keepdims=True)
    hn = (h - mu) / jnp.sqrt(var + 1e-5) * gamma + beta
    hn = jnp.maximum(hn, 0.0)
    dyn = jnp.zeros_like(hn)
    for i in range(complexity):
        f = _BASE_FUNCS[i % len(_BASE_FUNCS)]
        t = jnp.clip(hn * exps_t[i:i + 1], -10.0, 10.0)
        term = coeffs_t[i:i + 1] * f(t)
        term = jnp.nan_to_num(term, nan=0.0, posinf=10000.0, neginf=-10000.0)
        dyn = dyn + term
    return jnp.clip(dyn @ w_out + b_out, -100.0, 100.0)


# ------------------------------ main -----------------------------------------

if __name__ == "__main__":
    # TODO(synk): the PyTorch forward's tensor-coercion / reshape argument
    # validation is host-side Python and is not reproduced in the kernel.
    input_dim, output_dim, complexity, batch = 16, 8, 5, 8

    key = jax.random.PRNGKey(0)
    k_params, k_x = jax.random.split(key)
    internal_dim, params = make_unit_params(k_params, input_dim, output_dim, complexity)
    x = jax.random.normal(k_x, (batch, input_dim), jnp.float32)

    padded_params = pad_unit_params(params)
    forward = make_forward(input_dim, output_dim, internal_dim, complexity)

    y = forward(x, padded_params)
    jax.block_until_ready(y)

    y_ref = reference_forward(x, params, complexity)
    assert y.shape == (batch, output_dim)
    assert bool(jnp.all(jnp.isfinite(y)))
    assert bool(jnp.allclose(y, y_ref, rtol=1e-4, atol=1e-5)), "kernel != reference"

    print("KERNEL_OK")
</pallas_src>

<mosaic_0001>
module attributes {stable_mosaic.version = 11 : i64} {
  func.func @_deu_kernel(%arg0: i32, %arg1: memref<8x128xf32, #tpu.memory_space<vmem>>, %arg2: memref<128x128xf32, #tpu.memory_space<vmem>>, %arg3: memref<1x128xf32, #tpu.memory_space<vmem>>, %arg4: memref<1x128xf32, #tpu.memory_space<vmem>>, %arg5: memref<1x128xf32, #tpu.memory_space<vmem>>, %arg6: memref<5x128xf32, #tpu.memory_space<vmem>>, %arg7: memref<5x128xf32, #tpu.memory_space<vmem>>, %arg8: memref<128x128xf32, #tpu.memory_space<vmem>>, %arg9: memref<1x128xf32, #tpu.memory_space<vmem>>, %arg10: memref<8x128xf32, #tpu.memory_space<vmem>>) attributes {dimension_semantics = [#tpu.dimension_semantics<parallel>], iteration_bounds = array<i64: 1>, scalar_prefetch = 0 : i64, scratch_operands = 0 : i64, tpu.core_type = #tpu.core_type<tc>, window_params = [{transform_indices = @transform_0, window_bounds = array<i64: 8, 128>}, {pipeline_mode = #tpu.pipeline_mode<synchronous>, transform_indices = @transform_1, window_bounds = array<i64: 128, 128>}, {pipeline_mode = #tpu.pipeline_mode<synchronous>, transform_indices = @transform_2, window_bounds = array<i64: 1, 128>}, {pipeline_mode = #tpu.pipeline_mode<synchronous>, transform_indices = @transform_3, window_bounds = array<i64: 1, 128>}, {pipeline_mode = #tpu.pipeline_mode<synchronous>, transform_indices = @transform_4, window_bounds = array<i64: 1, 128>}, {pipeline_mode = #tpu.pipeline_mode<synchronous>, transform_indices = @transform_5, window_bounds = array<i64: 5, 128>}, {pipeline_mode = #tpu.pipeline_mode<synchronous>, transform_indices = @transform_6, window_bounds = array<i64: 5, 128>}, {pipeline_mode = #tpu.pipeline_mode<synchronous>, transform_indices = @transform_7, window_bounds = array<i64: 128, 128>}, {pipeline_mode = #tpu.pipeline_mode<synchronous>, transform_indices = @transform_8, window_bounds = array<i64: 1, 128>}, {transform_indices = @transform_9, window_bounds = array<i64: 8, 128>}]} {
    %c0 = arith.constant 0 : index
    %c0_0 = arith.constant 0 : index
    %0 = vector.load %arg1[%c0, %c0_0] : memref<8x128xf32, #tpu.memory_space<vmem>>, vector<8x128xf32>
    %c0_1 = arith.constant 0 : index
    %c0_2 = arith.constant 0 : index
    %1 = vector.load %arg2[%c0_1, %c0_2] : memref<128x128xf32, #tpu.memory_space<vmem>>, vector<128x128xf32>
    %cst = arith.constant dense<0.000000e+00> : vector<8x128xf32>
    %2 = tpu.matmul %0, %1, %cst {dimension_numbers = #tpu.dot_dimension_numbers<[1], [0], [0], [1], [0, 0, 1, 1], [], []>} : vector<8x128xf32>, vector<128x128xf32>, vector<8x128xf32> -> vector<8x128xf32>
    %c0_3 = arith.constant 0 : index
    %c0_4 = arith.constant 0 : index
    %3 = vector.load %arg3[%c0_3, %c0_4] : memref<1x128xf32, #tpu.memory_space<vmem>>, vector<1x128xf32>
    %4 = vector.broadcast %3 : vector<1x128xf32> to vector<8x128xf32>
    %5 = arith.addf %2, %4 : vector<8x128xf32>
    %cst_5 = arith.constant dense<0.000000e+00> : vector<8xf32>
    %6 = vector.multi_reduction <add>, %5, %cst_5 [1] : vector<8x128xf32> to vector<8xf32>
    %7 = vector.shape_cast %6 : vector<8xf32> to vector<8x1xf32>
    %cst_6 = arith.constant 0.111111112 : f32
    %8 = vector.broadcast %cst_6 : f32 to vector<8x1xf32>
    %9 = arith.mulf %7, %8 : vector<8x1xf32>
    %10 = arith.mulf %5, %5 : vector<8x128xf32>
    %cst_7 = arith.constant dense<0.000000e+00> : vector<8xf32>
    %11 = vector.multi_reduction <add>, %10, %cst_7 [1] : vector<8x128xf32> to vector<8xf32>
    %12 = vector.shape_cast %11 : vector<8xf32> to vector<8x1xf32>
    %cst_8 = arith.constant 0.111111112 : f32
    %13 = vector.broadcast %cst_8 : f32 to vector<8x1xf32>
    %14 = arith.mulf %12, %13 : vector<8x1xf32>
    %15 = arith.mulf %9, %9 : vector<8x1xf32>
    %16 = arith.subf %14, %15 : vector<8x1xf32>
    %17 = vector.broadcast %9 : vector<8x1xf32> to vector<8x128xf32>
    %18 = arith.subf %5, %17 : vector<8x128xf32>
    %cst_9 = arith.constant 9.99999974E-6 : f32
    %19 = vector.broadcast %cst_9 : f32 to vector<8x1xf32>
    %20 = arith.addf %16, %19 : vector<8x1xf32>
    %21 = math.rsqrt %20 : vector<8x1xf32>
    %22 = vector.broadcast %21 : vector<8x1xf32> to vector<8x128xf32>
    %23 = arith.mulf %18, %22 : vector<8x128xf32>
    %c0_10 = arith.constant 0 : index
    %c0_11 = arith.constant 0 : index
    %24 = vector.load %arg4[%c0_10, %c0_11] : memref<1x128xf32, #tpu.memory_space<vmem>>, vector<1x128xf32>
    %25 = vector.broadcast %24 : vector<1x128xf32> to vector<8x128xf32>
    %26 = arith.mulf %23, %25 : vector<8x128xf32>
    %c0_12 = arith.constant 0 : index
    %c0_13 = arith.constant 0 : index
    %27 = vector.load %arg5[%c0_12, %c0_13] : memref<1x128xf32, #tpu.memory_space<vmem>>, vector<1x128xf32>
    %28 = vector.broadcast %27 : vector<1x128xf32> to vector<8x128xf32>
    %29 = arith.addf %26, %28 : vector<8x128xf32>
    %cst_14 = arith.constant 0.000000e+00 : f32
    %30 = vector.broadcast %cst_14 : f32 to vector<8x128xf32>
    %31 = arith.maximumf %29, %30 : vector<8x128xf32>
    %c0_15 = arith.constant 0 : index
    %c0_16 = arith.constant 0 : index
    %32 = vector.load %arg6[%c0_15, %c0_16] : memref<5x128xf32, #tpu.memory_space<vmem>>, vector<5x128xf32>
    %c0_17 = arith.constant 0 : index
    %c0_18 = arith.constant 0 : index
    %33 = vector.load %arg7[%c0_17, %c0_18] : memref<5x128xf32, #tpu.memory_space<vmem>>, vector<5x128xf32>
    %cst_19 = arith.constant 0.000000e+00 : f32
    %34 = vector.broadcast %cst_19 : f32 to vector<8x128xf32>
    %35 = vector.extract_strided_slice %33 {offsets = [0, 0], sizes = [1, 128], strides = [1, 1]} : vector<5x128xf32> to vector<1x128xf32>
    %36 = vector.broadcast %35 : vector<1x128xf32> to vector<8x128xf32>
    %37 = arith.mulf %31, %36 : vector<8x128xf32>
    %cst_20 = arith.constant -1.000000e+01 : f32
    %cst_21 = arith.constant 1.000000e+01 : f32
    %38 = vector.broadcast %cst_20 : f32 to vector<8x128xf32>
    %39 = arith.maximumf %38, %37 : vector<8x128xf32>
    %40 = vector.broadcast %cst_21 : f32 to vector<8x128xf32>
    %41 = arith.minimumf %40, %39 : vector<8x128xf32>
    %42 = vector.extract_strided_slice %32 {offsets = [0, 0], sizes = [1, 128], strides = [1, 1]} : vector<5x128xf32> to vector<1x128xf32>
    %43 = math.sin %41 : vector<8x128xf32>
    %44 = vector.broadcast %42 : vector<1x128xf32> to vector<8x128xf32>
    %45 = arith.mulf %44, %43 : vector<8x128xf32>
    %46 = arith.addf %34, %45 : vector<8x128xf32>
    %47 = vector.extract_strided_slice %33 {offsets = [1, 0], sizes = [1, 128], strides = [1, 1]} : vector<5x128xf32> to vector<1x128xf32>
    %48 = vector.broadcast %47 : vector<1x128xf32> to vector<8x128xf32>
    %49 = arith.mulf %31, %48 : vector<8x128xf32>
    %cst_22 = arith.constant -1.000000e+01 : f32
    %cst_23 = arith.constant 1.000000e+01 : f32
    %50 = vector.broadcast %cst_22 : f32 to vector<8x128xf32>
    %51 = arith.maximumf %50, %49 : vector<8x128xf32>
    %52 = vector.broadcast %cst_23 : f32 to vector<8x128xf32>
    %53 = arith.minimumf %52, %51 : vector<8x128xf32>
    %54 = vector.extract_strided_slice %32 {offsets = [1, 0], sizes = [1, 128], strides = [1, 1]} : vector<5x128xf32> to vector<1x128xf32>
    %55 = math.cos %53 : vector<8x128xf32>
    %56 = vector.broadcast %54 : vector<1x128xf32> to vector<8x128xf32>
    %57 = arith.mulf %56, %55 : vector<8x128xf32>
    %58 = arith.addf %46, %57 : vector<8x128xf32>
    %59 = vector.extract_strided_slice %33 {offsets = [2, 0], sizes = [1, 128], strides = [1, 1]} : vector<5x128xf32> to vector<1x128xf32>
    %60 = vector.broadcast %59 : vector<1x128xf32> to vector<8x128xf32>
    %61 = arith.mulf %31, %60 : vector<8x128xf32>
    %cst_24 = arith.constant -1.000000e+01 : f32
    %cst_25 = arith.constant 1.000000e+01 : f32
    %62 = vector.broadcast %cst_24 : f32 to vector<8x128xf32>
    %63 = arith.maximumf %62, %61 : vector<8x128xf32>
    %64 = vector.broadcast %cst_25 : f32 to vector<8x128xf32>
    %65 = arith.minimumf %64, %63 : vector<8x128xf32>
    %66 = vector.extract_strided_slice %32 {offsets = [2, 0], sizes = [1, 128], strides = [1, 1]} : vector<5x128xf32> to vector<1x128xf32>
    %67 = math.tanh %65 : vector<8x128xf32>
    %68 = vector.broadcast %66 : vector<1x128xf32> to vector<8x128xf32>
    %69 = arith.mulf %68, %67 : vector<8x128xf32>
    %70 = arith.addf %58, %69 : vector<8x128xf32>
    %71 = vector.extract_strided_slice %33 {offsets = [3, 0], sizes = [1, 128], strides = [1, 1]} : vector<5x128xf32> to vector<1x128xf32>
    %72 = vector.broadcast %71 : vector<1x128xf32> to vector<8x128xf32>
    %73 = arith.mulf %31, %72 : vector<8x128xf32>
    %cst_26 = arith.constant -1.000000e+01 : f32
    %cst_27 = arith.constant 1.000000e+01 : f32
    %74 = vector.broadcast %cst_26 : f32 to vector<8x128xf32>
    %75 = arith.maximumf %74, %73 : vector<8x128xf32>
    %76 = vector.broadcast %cst_27 : f32 to vector<8x128xf32>
    %77 = arith.minimumf %76, %75 : vector<8x128xf32>
    %78 = vector.extract_strided_slice %32 {offsets = [3, 0], sizes = [1, 128], strides = [1, 1]} : vector<5x128xf32> to vector<1x128xf32>
    %79 = arith.negf %77 : vector<8x128xf32>
    %80 = math.exp %79 : vector<8x128xf32>
    %cst_28 = arith.constant 1.000000e+00 : f32
    %81 = vector.broadcast %cst_28 : f32 to vector<8x128xf32>
    %82 = arith.addf %81, %80 : vector<8x128xf32>
    %83 = arith.divf %81, %82 : vector<8x128xf32>
    %84 = arith.mulf %77, %83 : vector<8x128xf32>
    %85 = vector.broadcast %78 : vector<1x128xf32> to vector<8x128xf32>
    %86 = arith.mulf %85, %84 : vector<8x128xf32>
    %87 = arith.addf %70, %86 : vector<8x128xf32>
    %88 = vector.extract_strided_slice %33 {offsets = [4, 0], sizes = [1, 128], strides = [1, 1]} : vector<5x128xf32> to vector<1x128xf32>
    %89 = vector.broadcast %88 : vector<1x128xf32> to vector<8x128xf32>
    %90 = arith.mulf %31, %89 : vector<8x128xf32>
    %cst_29 = arith.constant -1.000000e+01 : f32
    %cst_30 = arith.constant 1.000000e+01 : f32
    %91 = vector.broadcast %cst_29 : f32 to vector<8x128xf32>
    %92 = arith.maximumf %91, %90 : vector<8x128xf32>
    %93 = vector.broadcast %cst_30 : f32 to vector<8x128xf32>
    %94 = arith.minimumf %93, %92 : vector<8x128xf32>
    %95 = vector.extract_strided_slice %32 {offsets = [4, 0], sizes = [1, 128], strides = [1, 1]} : vector<5x128xf32> to vector<1x128xf32>
    %cst_31 = arith.constant 0.000000e+00 : f32
    %cst_32 = arith.constant 6.000000e+00 : f32
    %96 = vector.broadcast %cst_31 : f32 to vector<8x128xf32>
    %97 = arith.maximumf %96, %94 : vector<8x128xf32>
    %98 = vector.broadcast %cst_32 : f32 to vector<8x128xf32>
    %99 = arith.minimumf %98, %97 : vector<8x128xf32>
    %100 = vector.broadcast %95 : vector<1x128xf32> to vector<8x128xf32>
    %101 = arith.mulf %100, %99 : vector<8x128xf32>
    %102 = arith.addf %87, %101 : vector<8x128xf32>
    %c0_33 = arith.constant 0 : index
    %c0_34 = arith.constant 0 : index
    %103 = vector.load %arg8[%c0_33, %c0_34] : memref<128x128xf32, #tpu.memory_space<vmem>>, vector<128x128xf32>
    %cst_35 = arith.constant dense<0.000000e+00> : vector<8x128xf32>
    %104 = tpu.matmul %102, %103, %cst_35 {dimension_numbers = #tpu.dot_dimension_numbers<[1], [0], [0], [1], [0, 0, 1, 1], [], []>} : vector<8x128xf32>, vector<128x128xf32>, vector<8x128xf32> -> vector<8x128xf32>
    %c0_36 = arith.constant 0 : index
    %c0_37 = arith.constant 0 : index
    %105 = vector.load %arg9[%c0_36, %c0_37] : memref<1x128xf32, #tpu.memory_space<vmem>>, vector<1x128xf32>
    %106 = vector.broadcast %105 : vector<1x128xf32> to vector<8x128xf32>
    %107 = arith.addf %104, %106 : vector<8x128xf32>
    %cst_38 = arith.constant -1.000000e+02 : f32
    %cst_39 = arith.constant 1.000000e+02 : f32
    %108 = vector.broadcast %cst_38 : f32 to vector<8x128xf32>
    %109 = arith.maximumf %108, %107 : vector<8x128xf32>
    %110 = vector.broadcast %cst_39 : f32 to vector<8x128xf32>
    %111 = arith.minimumf %110, %109 : vector<8x128xf32>
    %c0_40 = arith.constant 0 : index
    %c0_41 = arith.constant 0 : index
    %112 = vector.load %arg10[%c0_40, %c0_41] : memref<8x128xf32, #tpu.memory_space<vmem>>, vector<8x128xf32>
    tpu.vector_store %arg10[%c0_40, %c0_41], %111 {strides = array<i32>} : memref<8x128xf32, #tpu.memory_space<vmem>>, vector<8x128xf32>,
    return
  }
  func.func @transform_0(%arg0: i32) -> (i32, i32) {
    %c0_i32 = arith.constant 0 : i32
    %c0_i32_0 = arith.constant 0 : i32
    return %arg0, %c0_i32 : i32, i32
  }
  func.func @transform_1(%arg0: i32) -> (i32, i32) {
    %c0_i32 = arith.constant 0 : i32
    %c0_i32_0 = arith.constant 0 : i32
    %c0_i32_1 = arith.constant 0 : i32
    return %c0_i32, %c0_i32_0 : i32, i32
  }
  func.func @transform_2(%arg0: i32) -> (i32, i32) {
    %c0_i32 = arith.constant 0 : i32
    %c0_i32_0 = arith.constant 0 : i32
    %c0_i32_1 = arith.constant 0 : i32
    return %c0_i32, %c0_i32_0 : i32, i32
  }
  func.func @transform_3(%arg0: i32) -> (i32, i32) {
    %c0_i32 = arith.constant 0 : i32
    %c0_i32_0 = arith.constant 0 : i32
    %c0_i32_1 = arith.constant 0 : i32
    return %c0_i32, %c0_i32_0 : i32, i32
  }
  func.func @transform_4(%arg0: i32) -> (i32, i32) {
    %c0_i32 = arith.constant 0 : i32
    %c0_i32_0 = arith.constant 0 : i32
    %c0_i32_1 = arith.constant 0 : i32
    return %c0_i32, %c0_i32_0 : i32, i32
  }
  func.func @transform_5(%arg0: i32) -> (i32, i32) {
    %c0_i32 = arith.constant 0 : i32
    %c0_i32_0 = arith.constant 0 : i32
    %c0_i32_1 = arith.constant 0 : i32
    return %c0_i32, %c0_i32_0 : i32, i32
  }
  func.func @transform_6(%arg0: i32) -> (i32, i32) {
    %c0_i32 = arith.constant 0 : i32
    %c0_i32_0 = arith.constant 0 : i32
    %c0_i32_1 = arith.constant 0 : i32
    return %c0_i32, %c0_i32_0 : i32, i32
  }
  func.func @transform_7(%arg0: i32) -> (i32, i32) {
    %c0_i32 = arith.constant 0 : i32
    %c0_i32_0 = arith.constant 0 : i32
    %c0_i32_1 = arith.constant 0 : i32
    return %c0_i32, %c0_i32_0 : i32, i32
  }
  func.func @transform_8(%arg0: i32) -> (i32, i32) {
    %c0_i32 = arith.constant 0 : i32
    %c0_i32_0 = arith.constant 0 : i32
    %c0_i32_1 = arith.constant 0 : i32
    return %c0_i32, %c0_i32_0 : i32, i32
  }
  func.func @transform_9(%arg0: i32) -> (i32, i32) {
    %c0_i32 = arith.constant 0 : i32
    %c0_i32_0 = arith.constant 0 : i32
    return %arg0, %c0_i32 : i32, i32
  }
}

</mosaic_0001>

<bundles_post_ra>
// kernel: forward.1
= control target key start
LH: loop header
LB: loop body
LE: loop exit
PB: predicated region body
PF: predicated region fallthrough
CT: control target
= control target key end

     0   :  { %14 = vsyncpa [#allocation3], 0  ;;  %s1099_s0 = inlined_call_operand.vmem [shape: f32[8,128], index: 0, kind: input, shape index: {}]   ;;  %s1100_s1 = inlined_call_operand.hbm [shape: f32[128,128], index: 1, kind: input, shape index: {}]   ;;  %s1101_s2 = inlined_call_operand.vmem [shape: f32[1,128], index: 2, kind: input, shape index: {}]   ;;  %s1102_s3 = inlined_call_operand.vmem [shape: f32[1,128], index: 3, kind: input, shape index: {}]   ;;  %s1103_s4 = inlined_call_operand.vmem [shape: f32[1,128], index: 4, kind: input, shape index: {}]   ;;  %s1104_s5 = inlined_call_operand.vmem [shape: f32[5,128], index: 5, kind: input, shape index: {}]   ;;  %s1105_s6 = inlined_call_operand.vmem [shape: f32[5,128], index: 6, kind: input, shape index: {}]   ;;  %s1106_s7 = inlined_call_operand.hbm [shape: f32[128,128], index: 7, kind: input, shape index: {}]   ;;  %s1107_s8 = inlined_call_operand.vmem [shape: f32[1,128], index: 8, kind: input, shape index: {}]   ;;  %s1108_s9 = inlined_call_operand.hbm [shape: f32[8,128], index: 9, kind: output, shape index: {}]  }
   0x1   :  { %15 = vsyncpa [#allocation6], 0 }
   0x2   :  { %16 = vsyncpa [#allocation4], 0  ;;  %s807_s30 = smov [#allocation2]  }
   0x3   :  { %s24_s10 = sshll.u32 %s807_s30, 4  ;;  %s25_s10 = int_to_ptr.vmem [resolvable:$true] %s24_s10 }
   0x4   :  { %s749_s11 = scalar_lea.vmem %s25_s10, 2048  ;;  %p754_p1 = scmp.lt.s32.totalorder %s25_s10, %s25_s10 }
   0x5   :  { %p750_p0 = scmp.ne.s32.totalorder %s25_s10, %s749_s11  ;;  %p755_p2 = scmp.lt.s32.totalorder %s749_s11, %s749_s11 }
   0x7   :  { %p756_p3 = por %p755_p2, %p754_p1 }
   0x9   :  { %p757_p4 = pnand %p756_p3, %p750_p0 }
   0xb   :  { %760 = shalt.err (!%p757_p4)
}
   0xc   :  { %s808_s12 = smov 128   ;;  %s809_s13 = smov 8  }
   0xd   :  { %30 = dma.hbm_to_vmem [thread:$0]  %s1100_s1, 2048, %s25_s10, [#allocation3], %s808_s12, %s808_s12, %s809_s13  }
   0xe   :  { %s810_s16 = smov [#allocation5]  }
   0xf   :  { %s46_s17 = sshll.u32 %s810_s16, 4  ;;  %s47_s17 = int_to_ptr.vmem [resolvable:$true] %s46_s17 }
  0x10   :  { %s769_s18 = scalar_lea.vmem %s47_s17, 2048  ;;  %p774_p6 = scmp.lt.s32.totalorder %s47_s17, %s47_s17 }
  0x11   :  { %p770_p5 = scmp.ne.s32.totalorder %s47_s17, %s769_s18  ;;  %p775_p7 = scmp.lt.s32.totalorder %s769_s18, %s769_s18 }
  0x13   :  { %p776_p8 = por %p775_p7, %p774_p6 }
  0x15   :  { %p777_p9 = pnand %p776_p8, %p770_p5 }
  0x17   :  { %780 = shalt.err (!%p777_p9)
}
  0x18   :  { %52 = dma.hbm_to_vmem [thread:$0]  %s1106_s7, 2048, %s47_s17, [#allocation6], %s808_s12, %s808_s12, %s809_s13  }
  0x19   :  { %801 = dma.done.wait [#allocation3], 2048  }
  0x1a   :  { %802 = vsyncadd [#allocation3], 4294965248 }
  0x1b   :  { %803 = dma.done.wait [#allocation6], 2048  }
  0x1c   :  { %804 = vsyncadd [#allocation6], 4294965248  ;;  %v811_v0 = vmov 0.0   ;;  %vm812_vm0 = vmmov 0   ;;  %v77_v1 = vld [vmem:[#allocation2 + $0x78] sm:$0xff]  ;;  %v76_v2 = vld [vmem:[#allocation2 + $0x70] sm:$0xff]  ;;  %v187_v27 = vlaneseq }
  0x1d   :  { %634 = vmatprep.subr.mxu0 %v811_v0  ;;  %666 = vmatprep.mubr.msk.f32.mxu0 %vm812_vm0, %v811_v0  ;;  %v75_v3 = vld [vmem:[#allocation2 + $0x68] sm:$0xff]  ;;  %v74_v4 = vld [vmem:[#allocation2 + $0x60] sm:$0xff]  ;;  %v73_v5 = vld [vmem:[#allocation2 + $0x58] sm:$0xff]  ;;  %s819_s27 = smov [#allocation7]  }
  0x1e   :  { %669 = vmatprep.subr.mxu1 %v811_v0  ;;  %701 = vmatprep.mubr.msk.f32.mxu1 %vm812_vm0, %v811_v0  ;;  %v72_v6 = vld [vmem:[#allocation2 + $0x50] sm:$0xff]  ;;  %v71_v7 = vld [vmem:[#allocation2 + $0x48] sm:$0xff]  ;;  %v70_v8 = vld [vmem:[#allocation2 + $0x40] sm:$0xff]  ;;  %v910_v30 = vshrl.u32 %v187_v27, 7  ;;  %s571_s28 = sshll.u32 %s819_s27, 4  ;;  %s572_s28 = int_to_ptr.vmem [resolvable:$true] %s571_s28 }
  0x1f   :  { %635 = vmatpush3.msra.mxu0 %v77_v1  ;;  %v69_v9 = vld [vmem:[#allocation2 + $0x38] sm:$0xff]  ;;  %v68_v10 = vld [vmem:[#allocation2 + $0x30] sm:$0xff]  ;;  %v67_v11 = vld [vmem:[#allocation2 + $0x28] sm:$0xff]  ;;  %s781_s29 = scalar_lea.vmem %s572_s28, 128  ;;  %p786_p11 = scmp.lt.s32.totalorder %s572_s28, %s572_s28 }
  0x20   :  { %636 = vmatprep.subr.mxu0 %v811_v0  ;;  %v66_v12 = vld [vmem:[#allocation2 + $0x20] sm:$0xff]  ;;  %v65_v13 = vld [vmem:[#allocation2 + $0x18] sm:$0xff]  ;;  %v64_v14 = vld [vmem:[#allocation2 + $0x10] sm:$0xff]  ;;  %v422_v34 = vsub.s32 2, %v910_v30  ;;  %v456_v37 = vsub.s32 4, %v910_v30  ;;  %v189_v57 = vsub.s32 0, %v910_v30  ;;  %p782_p10 = scmp.ne.s32.totalorder %s572_s28, %s781_s29  ;;  %p787_p12 = scmp.lt.s32.totalorder %s781_s29, %s781_s29 }
  0x21   :  { %637 = vmatpush3.msra.mxu0 %v76_v2  ;;  %v63_v15 = vld [vmem:[#allocation2 + $0x8] sm:$0xff]  ;;  %v62_v16 = vld [vmem:[#allocation2] sm:$0xff]  ;;  %v484_v23 = vld [vmem:[#allocation5 + $0x78] sm:$0xff]  ;;  %v306_v58 = vsub.s32 1, %v910_v30 }
  0x22   :  { %638 = vmatprep.subr.mxu0 %v811_v0  ;;  %v61_v17 = vld [vmem:[%s1099_s0] sm:$0xff]  ;;  %v483_v24 = vld [vmem:[#allocation5 + $0x70] sm:$0xff]  ;;  %670 = vmatpush3.msra.mxu1 %v484_v23  ;;  %v482_v25 = vld [vmem:[#allocation5 + $0x68] sm:$0xff]  ;;  %p788_p13 = por %p787_p12, %p786_p11 }
  0x23   :  { %639 = vmatpush3.msra.mxu0 %v75_v3  ;;  %v581_v18 = vld [vmem:[%s1101_s2] ss:$0 sm:$0xff]  ;;  %671 = vmatprep.subr.mxu1 %v811_v0  ;;  %v480_v28 = vld [vmem:[#allocation5 + $0x58] sm:$0xff]  ;;  %v479_v29 = vld [vmem:[#allocation5 + $0x50] sm:$0xff] }
  0x24   :  { %640 = vmatprep.subr.mxu0 %v811_v0  ;;  %672 = vmatpush3.msra.mxu1 %v483_v24  ;;  %v481_v26 = vld [vmem:[#allocation5 + $0x60] sm:$0xff]  ;;  %v478_v31 = vld [vmem:[#allocation5 + $0x48] sm:$0xff]  ;;  %v476_v35 = vld [vmem:[#allocation5 + $0x38] sm:$0xff]  ;;  %p789_p0 = pnand %p788_p13, %p782_p10 }
  0x25   :  { %641 = vmatpush3.msra.mxu0 %v74_v4  ;;  %673 = vmatprep.subr.mxu1 %v811_v0  ;;  %v477_v32 = vld [vmem:[#allocation5 + $0x40] sm:$0xff]  ;;  %v475_v38 = vld [vmem:[#allocation5 + $0x30] sm:$0xff]  ;;  %v474_v40 = vld [vmem:[#allocation5 + $0x28] sm:$0xff] }
  0x26   :  { %642 = vmatprep.subr.mxu0 %v811_v0  ;;  %674 = vmatpush3.msra.mxu1 %v482_v25  ;;  %v917_v33 = vld [vmem:[%s1105_s6] sm:$0x1f]  ;;  %v472_v42 = vld [vmem:[#allocation5 + $0x18] sm:$0xff]  ;;  %v471_v43 = vld [vmem:[#allocation5 + $0x10] sm:$0xff] }
  0x27   :  { %643 = vmatpush3.msra.mxu0 %v73_v5  ;;  %675 = vmatprep.subr.mxu1 %v811_v0  ;;  %v423_v36 = vrot.slane %v917_v33, %v422_v34  ;;  %v457_v39 = vrot.slane %v917_v33, %v456_v37  ;;  %v473_v41 = vld [vmem:[#allocation5 + $0x20] sm:$0xff]  ;;  %v470_v44 = vld [vmem:[#allocation5 + $0x8] sm:$0xff]  ;;  %v190_v62 = vrot.slane %v917_v33, %v189_v57 }
  0x28   :  { %644 = vmatprep.subr.mxu0 %v811_v0  ;;  %676 = vmatpush3.msra.mxu1 %v481_v26  ;;  %v469_v45 = vld [vmem:[#allocation5] sm:$0xff]  ;;  %v307_v63 = vrot.slane %v917_v33, %v306_v58 }
  0x29   :  { %645 = vmatpush3.msra.mxu0 %v72_v6  ;;  %677 = vmatprep.subr.mxu1 %v811_v0  ;;  %v582_v55 = vld [vmem:[%s1102_s3] ss:$0 sm:$0xff] }
  0x2a   :  { %646 = vmatprep.subr.mxu0 %v811_v0  ;;  %678 = vmatpush3.msra.mxu1 %v480_v28  ;;  %v583_v59 = vld [vmem:[%s1103_s4] ss:$0 sm:$0xff] }
  0x2b   :  { %647 = vmatpush3.msra.mxu0 %v71_v7  ;;  %679 = vmatprep.subr.mxu1 %v811_v0  ;;  %v962_v7 = vld [vmem:[%s1104_s5] sm:$0x1f] }
  0x2c   :  { %648 = vmatprep.subr.mxu0 %v811_v0  ;;  %680 = vmatpush3.msra.mxu1 %v479_v29 }
  0x2d   :  { %649 = vmatpush3.msra.mxu0 %v70_v8  ;;  %681 = vmatprep.subr.mxu1 %v811_v0 }
  0x2e   :  { %650 = vmatprep.subr.mxu0 %v811_v0  ;;  %682 = vmatpush3.msra.mxu1 %v478_v31 }
  0x2f   :  { %651 = vmatpush3.msra.mxu0 %v69_v9  ;;  %683 = vmatprep.subr.mxu1 %v811_v0 }
  0x30   :  { %652 = vmatprep.subr.mxu0 %v811_v0  ;;  %684 = vmatpush3.msra.mxu1 %v477_v32 }
  0x31   :  { %653 = vmatpush3.msra.mxu0 %v68_v10  ;;  %685 = vmatprep.subr.mxu1 %v811_v0 }
  0x32   :  { %654 = vmatprep.subr.mxu0 %v811_v0  ;;  %686 = vmatpush3.msra.mxu1 %v476_v35 }
  0x33   :  { %655 = vmatpush3.msra.mxu0 %v67_v11  ;;  %687 = vmatprep.subr.mxu1 %v811_v0 }
  0x34   :  { %656 = vmatprep.subr.mxu0 %v811_v0  ;;  %688 = vmatpush3.msra.mxu1 %v475_v38 }
  0x35   :  { %657 = vmatpush3.msra.mxu0 %v66_v12  ;;  %689 = vmatprep.subr.mxu1 %v811_v0 }
  0x36   :  { %658 = vmatprep.subr.mxu0 %v811_v0  ;;  %690 = vmatpush3.msra.mxu1 %v474_v40 }
  0x37   :  { %659 = vmatpush3.msra.mxu0 %v65_v13  ;;  %691 = vmatprep.subr.mxu1 %v811_v0 }
  0x38   :  { %660 = vmatprep.subr.mxu0 %v811_v0  ;;  %692 = vmatpush3.msra.mxu1 %v473_v41 }
  0x39   :  { %661 = vmatpush3.msra.mxu0 %v64_v14  ;;  %693 = vmatprep.subr.mxu1 %v811_v0  ;;  %v466_v14 = vrot.slane %v962_v7, %v456_v37  ;;  %v982_v37 = vrot.slane %v962_v7, %v422_v34 }
  0x3a   :  { %662 = vmatprep.subr.mxu0 %v811_v0  ;;  %694 = vmatpush3.msra.mxu1 %v472_v42 }
  0x3b   :  { %663 = vmatpush3.msra.mxu0 %v63_v15  ;;  %695 = vmatprep.subr.mxu1 %v811_v0 }
  0x3c   :  { %664 = vmatprep.subr.mxu0 %v811_v0  ;;  %696 = vmatpush3.msra.mxu1 %v471_v43  ;;  %v814_v43 = vmov 2475754826  }
  0x3d   :  { %665 = vmatpush3.msra.mxu0 %v62_v16  ;;  %697 = vmatprep.subr.mxu1 %v811_v0 }
  0x3e   :  { %667 = vmatmul.mubr.f32.vlgmr.msra.gmra.mxu0 %v61_v17  ;;  %698 = vmatpush3.msra.mxu1 %v470_v44 }
  0x3f   :  { %699 = vmatprep.subr.mxu1 %v811_v0 }
  0x40   :  { %700 = vmatpush3.msra.mxu1 %v469_v45  ;;  %v815_v45 = vmov 2131351028  }
  0xfe   :  { %v151_v19 = vpop.f32.mrf.mxu0 }
  0xff   :  { %v901_v20 = vadd.f32 %v581_v18, %v151_v19 }
 0x100   :  { %v668_v21 = vpop.f32.mrf.mxu0 }
 0x101   :  { %155 = vadd.xlane.f32.xlu0 %v901_v20  ;;  %v158_v22 = vmul.f32 %v901_v20, %v901_v20 }
 0x105   :  { %159 = vadd.xlane.f32.xlu0 %v158_v22 }
 0x18a   :  { %v156_v46 = vpop.xlane.xlu0 %155 }
 0x18b   :  { %v157_v47 = vmul.f32 0.11111111, %v156_v46 }
 0x18d   :  { %v162_v49 = vmul.f32 %v157_v47, %v157_v47  ;;  %v164_v53 = vsub.f32 %v901_v20, %v157_v47  ;;  %v816_v47 = vmov 2102212464  }
 0x18e   :  { %v160_v48 = vpop.xlane.xlu0 %159 }
 0x18f   :  { %v161_v50 = vmul.f32 0.11111111, %v160_v48 }
 0x191   :  { %v163_v51 = vsub.f32 %v161_v50, %v162_v49  ;;  %v817_v49 = vmov 920167782  }
 0x193   :  { %v165_v52 = vadd.f32 1e-05, %v163_v51 }
 0x195   :  { %725 = vrsqrt.f32 %v165_v52 }
 0x1a2   :  { %v726_v54 = vpop.eup %725 }
 0x1a3   :  { %v167_v56 = vmul.f32 %v726_v54, %v164_v53 }
 0x1a5   :  { %v175_v60 = vmul.f32 %v582_v55, %v167_v56  ;;  %v818_v55 = vmov 1326507024  }
 0x1a7   :  { %v183_v61 = vadd.f32 %v583_v59, %v175_v60 }
 0x1a9   :  { %v949_v0 = vmax.f32 %v183_v61, 0.0 }
 0x1ab   :  { %v191_v1 = vmul.f32 %v190_v62, %v949_v0  ;;  %v308_v2 = vmul.f32 %v307_v63, %v949_v0  ;;  %v424_v3 = vmul.f32 %v423_v36, %v949_v0  ;;  %v458_v4 = vmul.f32 %v457_v39, %v949_v0 }
 0x1ac   :  { %v813_v39 = vmov 683565275  }
 0x1ad   :  { %v955_v5 = vclamps-f32 %v191_v1, 10.0  ;;  %v957_v6 = vclamps-f32 %v308_v2, 10.0  ;;  %v597_v8 = vclamps-f32 %v458_v4, 10.0  ;;  %v594_v23 = vclamps-f32 %v424_v3, 10.0 }
 0x1af   :  { %v194_v9 = vand.u32 2147483647, %v955_v5  ;;  %v197_v10 = vand.u32 2139095040, %v955_v5  ;;  %v311_v11 = vand.u32 2147483647, %v957_v6  ;;  %v314_v12 = vand.u32 2139095040, %v957_v6 }
 0x1b0   :  { %v461_v18 = vmax.f32 %v597_v8, 0.0  ;;  %727 = vtanh.f32 %v594_v23  ;;  %vm196_vm15 = vcmp.lt.s32.totalorder %v955_v5, 0 }
 0x1b1   :  { %v198_v13 = vshrl.u32 %v197_v10, 23  ;;  %v201_v15 = vand.u32 8388607, %v194_v9  ;;  %v315_v16 = vshrl.u32 %v314_v12, 23  ;;  %v318_v17 = vand.u32 8388607, %v311_v11 }
 0x1b2   :  { %v462_v21 = vmin.f32 %v461_v18, 6.0  ;;  %vm1053_vm0 = vcmp.le.f32.partialorder %v194_v9, 0.7853982 }
 0x1b3   :  { %v585_v19 = vadd.s32 4294967169, %v198_v13  ;;  %v590_v20 = vadd.s32 4294967169, %v315_v16  ;;  %v202_v24 = vor.u32 8388608, %v201_v15  ;;  %v319_v25 = vor.u32 8388608, %v318_v17 }
 0x1b4   :  { %v973_v27 = vmul.f32 %v466_v14, %v462_v21 }
 0x1b5   :  { %v204_v22 = vadd.s32 1, %v585_v19  ;;  %v321_v26 = vadd.s32 1, %v590_v20  ;;  %v975_v35 = vshll.u32 %v202_v24, 8  ;;  %v977_v36 = vshll.u32 %v319_v25, 8 }
 0x1b7   :  { %vm205_vm1 = vcmp.gt.s32.totalorder %v204_v22, 0  ;;  %vm322_vm2 = vcmp.gt.s32.totalorder %v321_v26, 0 }
 0x1b8   :  { %v206_v28 = vsel %vm205_vm1, %v204_v22, 0  ;;  %v323_v32 = vsel %vm322_vm2, %v321_v26, 0  ;;  %vm313_vm1 = vcmp.lt.s32.totalorder %v957_v6, 0  ;;  %vm1067_vm2 = vcmp.le.f32.partialorder %v311_v11, 0.7853982 }
 0x1b9   :  { %v207_v29 = vshrl.u32 %v206_v28, 5  ;;  %v208_v31 = vand.u32 31, %v206_v28  ;;  %v984_v41 = vshrl.u32 %v323_v32, 5  ;;  %v325_v42 = vand.u32 31, %v323_v32 }
 0x1bb   :  { %v209_v38 = vsub.s32 32, %v208_v31  ;;  %v211_v40 = vshll.u32 %v813_v39, %v208_v31  ;;  %v214_v44 = vshll.u32 %v814_v43, %v208_v31  ;;  %v217_v46 = vshll.u32 %v815_v45, %v208_v31 }
 0x1bc   :  { %v220_v48 = vshll.u32 %v816_v47, %v208_v31  ;;  %v223_v50 = vshll.u32 %v817_v49, %v208_v31  ;;  %vm226_vm3 = vcmp.lt.s32.totalorder %v207_v29, 1  ;;  %vm227_vm4 = vcmp.lt.s32.totalorder %v207_v29, 2 }
 0x1bd   :  { %v212_v51 = vshrl.u32 %v814_v43, %v209_v38  ;;  %v215_v52 = vshrl.u32 %v815_v45, %v209_v38  ;;  %v218_v53 = vshrl.u32 %v816_v47, %v209_v38  ;;  %v210_v34 = vshrl.u32 %v813_v39, %v209_v38 }
 0x1be   :  { %v221_v54 = vshrl.u32 %v817_v49, %v209_v38  ;;  %v224_v56 = vshrl.u32 %v818_v55, %v209_v38  ;;  %v326_v62 = vsub.s32 32, %v325_v42  ;;  %vm228_vm5 = vcmp.lt.s32.totalorder %v207_v29, 3 }
 0x1bf   :  { %v213_v59 = vor.u32 %v212_v51, %v211_v40  ;;  %v216_v60 = vor.u32 %v215_v52, %v214_v44  ;;  %v219_v61 = vor.u32 %v218_v53, %v217_v46  ;;  %vm229_vm6 = vcmp.lt.s32.totalorder %v207_v29, 4  ;;  %v728_v40 = vpop.eup %727 }
 0x1c0   :  { %v222_v63 = vor.u32 %v221_v54, %v220_v48  ;;  %v225_v1 = vor.u32 %v224_v56, %v223_v50  ;;  %v328_v14 = vshll.u32 %v813_v39, %v325_v42  ;;  %v329_v17 = vshrl.u32 %v814_v43, %v326_v62 }
 0x1c1   :  { %v230_v2 = vsel %vm226_vm3, %v210_v34, %v213_v59  ;;  %v231_v3 = vsel %vm229_vm6, %v219_v61, 2102212464  ;;  %v234_v4 = vsel %vm226_vm3, %v213_v59, %v216_v60  ;;  %v238_v8 = vsel %vm226_vm3, %v216_v60, %v219_v61 }
 0x1c2   :  { %v232_v10 = vsel %vm228_vm5, %v216_v60, %v231_v3  ;;  %v235_v12 = vsel %vm229_vm6, %v222_v63, 920167782  ;;  %v239_v13 = vsel %vm229_vm6, %v225_v1, 1326507024  ;;  %v331_v18 = vshll.u32 %v814_v43, %v325_v42 }
 0x1c3   :  { %v236_v15 = vsel %vm228_vm5, %v219_v61, %v235_v12  ;;  %v240_v16 = vsel %vm228_vm5, %v222_v63, %v239_v13  ;;  %v233_v19 = vsel %vm227_vm4, %v230_v2, %v232_v10  ;;  %v332_v22 = vshrl.u32 %v815_v45, %v326_v62 }
 0x1c4   :  { %v237_v20 = vsel %vm227_vm4, %v234_v4, %v236_v15  ;;  %v241_v21 = vsel %vm227_vm4, %v238_v8, %v240_v16  ;;  %v330_v28 = vor.u32 %v329_v17, %v328_v14  ;;  %v334_v32 = vshll.u32 %v815_v45, %v325_v42 }
 0x1c5   :  { %v993_v23 = vmul.u32.u64.low %v975_v35, %v241_v21  ;;  %v994_v24 = vmul.u32.u64.high %v975_v35, %v241_v21, %v993_v23  ;;  %v997_v25 = vmul.u32.u64.low %v975_v35, %v237_v20  ;;  %v998_v26 = vmul.u32.u64.high %v975_v35, %v237_v20, %v997_v25 }
 0x1c6   :  { %v333_v31 = vor.u32 %v332_v22, %v331_v18  ;;  %v335_v38 = vshrl.u32 %v816_v47, %v326_v62  ;;  %v327_v43 = vshrl.u32 %v813_v39, %v326_v62  ;;  %v337_v44 = vshll.u32 %v816_v47, %v325_v42 }
 0x1c7   :  { %v338_v46 = vshrl.u32 %v817_v49, %v326_v62  ;;  %v341_v29 = vshrl.u32 %v818_v55, %v326_v62  ;;  %v249_v48 = vmul.u32 %v975_v35, %v233_v19  ;;  %v340_v51 = vshll.u32 %v817_v49, %v325_v42 }
 0x1c8   :  { %v336_v50 = vor.u32 %v335_v38, %v334_v32  ;;  %vm343_vm7 = vcmp.lt.s32.totalorder %v984_v41, 1  ;;  %vm251_vm8 = vc.u32 %v994_v24, %v997_v25  ;;  %v252_v52 = vadd.s32 1, %v998_v26 }
 0x1c9   :  { %v339_v53 = vor.u32 %v338_v46, %v337_v44  ;;  %vm344_vm9 = vcmp.lt.s32.totalorder %v984_v41, 2  ;;  %v342_v45 = vor.u32 %v341_v29, %v340_v51  ;;  %vm345_vm10 = vcmp.lt.s32.totalorder %v984_v41, 3 }
 0x1ca   :  { %vm346_vm11 = vcmp.lt.s32.totalorder %v984_v41, 4  ;;  %v351_v39 = vsel %vm343_vm7, %v330_v28, %v333_v31  ;;  %v253_v35 = vsel %vm251_vm8, %v252_v52, %v998_v26  ;;  %v355_v49 = vsel %vm343_vm7, %v333_v31, %v336_v50 }
 0x1cb   :  { %v348_v47 = vsel %vm346_vm11, %v336_v50, 2102212464  ;;  %v352_v42 = vsel %vm346_vm11, %v339_v53, 920167782  ;;  %v254_v34 = vadd.s32 %v253_v35, %v249_v48  ;;  %v347_v54 = vsel %vm343_vm7, %v327_v43, %v330_v28 }
 0x1cc   :  { %v353_v55 = vsel %vm345_vm10, %v336_v50, %v352_v42  ;;  %v356_v56 = vsel %vm346_vm11, %v342_v45, 1326507024  ;;  %v349_v59 = vsel %vm345_vm10, %v333_v31, %v348_v47  ;;  %v1013_v62 = vmul.f32 %v728_v40, %v982_v37 }
 0x1cd   :  { %v354_v60 = vsel %vm344_vm9, %v351_v39, %v353_v55  ;;  %v357_v61 = vsel %vm345_vm10, %v339_v53, %v356_v56  ;;  %v255_v63 = vadd.s32 536870912, %v254_v34  ;;  %v350_v12 = vsel %vm344_vm9, %v347_v54, %v349_v59 }
 0x1ce   :  { %v358_v1 = vsel %vm344_vm9, %v355_v49, %v357_v61  ;;  %v1018_v2 = vmul.u32.u64.low %v977_v36, %v354_v60  ;;  %v1019_v3 = vmul.u32.u64.high %v977_v36, %v354_v60, %v1018_v2  ;;  %v366_v14 = vmul.u32 %v977_v36, %v350_v12 }
 0x1cf   :  { %v1022_v4 = vmul.u32.u64.low %v977_v36, %v358_v1  ;;  %v1023_v8 = vmul.u32.u64.high %v977_v36, %v358_v1, %v1022_v4  ;;  %v1025_v10 = vshrl.u32 %v255_v63, 30  ;;  %v436_v18 = vsub.s32 3, %v910_v30 }
 0x1d0   :  { %v369_v13 = vadd.s32 1, %v1019_v3  ;;  %v250_v40 = vadd.s32 %v997_v25, %v994_v24  ;;  %vm286_vm6 = vweird.f32 %v955_v5  ;;  %vm403_vm10 = vweird.f32 %v957_v6 }
 0x1d1   :  { %v257_v37 = vshll.u32 %v1025_v10, 30  ;;  %vm368_vm12 = vc.u32 %v1023_v8, %v1018_v2  ;;  %v437_v41 = vrot.slane %v917_v33, %v436_v18  ;;  %v367_v25 = vadd.s32 %v1018_v2, %v1023_v8 }
 0x1d2   :  { %v370_v16 = vsel %vm368_vm12, %v369_v13, %v1019_v3  ;;  %v280_v2 = vsub.s32 4, %v1025_v10 }
 0x1d3   :  { %v258_v15 = vsub.s32 %v254_v34, %v257_v37  ;;  %v371_v17 = vadd.s32 %v370_v16, %v366_v14  ;;  %v1042_v31 = vmul.f32 %v437_v41, %v949_v0 }
 0x1d4   :  { %v281_v37 = vsel %vm196_vm15, %v280_v2, %v1025_v10 }
 0x1d5   :  { %v260_v19 = vsub.s32 0, %v258_v15  ;;  %v372_v20 = vadd.s32 536870912, %v371_v17  ;;  %v595_v29 = vclamps-f32 %v1042_v31, 10.0 }
 0x1d7   :  { %v586_v21 = vmin.u32 %v260_v19, %v258_v15  ;;  %v1035_v22 = vshrl.u32 %v372_v20, 30  ;;  %v596_v0 = vmul.f32 -1.442695, %v595_v29 }
 0x1d9   :  { %v262_v23 = vclz %v586_v21  ;;  %v374_v36 = vshll.u32 %v1035_v22, 30  ;;  %729 = vpow2.f32 %v596_v0  ;;  %v397_v21 = vsub.s32 4, %v1035_v22 }
 0x1db   :  { %v587_v26 = vadd.s32 4294967294, %v262_v23  ;;  %v375_v28 = vsub.s32 %v371_v17, %v374_v36  ;;  %v398_v11 = vsel %vm313_vm1, %v397_v21, %v1035_v22 }
 0x1dd   :  { %vm588_vm13 = vcmp.lt.s32.totalorder %v587_v26, 0  ;;  %v377_v38 = vsub.s32 0, %v375_v28 }
 0x1de   :  { %v265_v32 = vsel %vm588_vm13, 0, %v587_v26 }
 0x1df   :  { %v266_v43 = vsub.s32 32, %v265_v32  ;;  %v270_v44 = vsub.s32 4294967266, %v265_v32  ;;  %v591_v46 = vmin.u32 %v377_v38, %v375_v28  ;;  %v267_v33 = vshll.u32 %v258_v15, %v265_v32 }
 0x1e0   :  { %v283_v15 = vsel %vm1053_vm0, 0, %v281_v37  ;;  %v400_v32 = vsel %vm1067_vm2, 0, %v398_v11 }
 0x1e1   :  { %v268_v48 = vshrl.u32 %v250_v40, %v266_v43  ;;  %v271_v50 = vadd.s32 127, %v270_v44  ;;  %v379_v51 = vclz %v591_v46  ;;  %v287_v10 = vadd.s32 3, %v283_v15 }
 0x1e2   :  { %v404_v43 = vand.u32 3, %v400_v32 }
 0x1e3   :  { %v269_v52 = vor.u32 %v268_v48, %v267_v33  ;;  %v272_v53 = vshll.u32 %v271_v50, 23  ;;  %v592_v45 = vadd.s32 4294967294, %v379_v51  ;;  %v288_v23 = vand.u32 3, %v287_v10 }
 0x1e4   :  { %v301_v48 = vrot.slane %v962_v7, %v189_v57  ;;  %vm409_vm7 = vcmp.eq.s32.totalorder %v404_v43, 2  ;;  %vm406_vm8 = vcmp.eq.s32.totalorder %v404_v43, 0  ;;  %vm405_vm9 = vcmp.lt.s32.totalorder %v404_v43, 2 }
 0x1e5   :  { %v273_v39 = vor.u32 4788187, %v272_v53  ;;  %vm593_vm14 = vcmp.lt.s32.totalorder %v592_v45, 0  ;;  %v276_v47 = vcvt.s32.f32 %v269_v52  ;;  %vm290_vm3 = vcmp.eq.s32.totalorder %v288_v23, 0 }
 0x1e6   :  { %v382_v24 = vsel %vm593_vm14, 0, %v592_v45  ;;  %v730_v9 = vpop.eup %729  ;;  %vm293_vm4 = vcmp.eq.s32.totalorder %v288_v23, 2  ;;  %vm289_vm5 = vcmp.lt.s32.totalorder %v288_v23, 2  ;;  %v417_v53 = vrot.slane %v962_v7, %v306_v58 }
 0x1e7   :  { %v274_v35 = vand.u32 2147483647, %v273_v39  ;;  %v383_v42 = vsub.s32 32, %v382_v24  ;;  %v387_v49 = vsub.s32 4294967266, %v382_v24  ;;  %v384_v54 = vshll.u32 %v375_v28, %v382_v24 }
 0x1e8   :  { %v444_v20 = vadd.f32 1.0, %v730_v9  ;;  %v451_v24 = vrot.slane %v962_v7, %v436_v18 }
 0x1e9   :  { %v277_v34 = vmul.f32 %v276_v47, %v274_v35  ;;  %v385_v55 = vshrl.u32 %v367_v25, %v383_v42  ;;  %v388_v56 = vadd.s32 127, %v387_v49 }
 0x1eb   :  { %v278_v59 = vxor.u32 2147483648, %v277_v34  ;;  %v386_v60 = vor.u32 %v385_v55, %v384_v54  ;;  %v389_v61 = vshll.u32 %v388_v56, 23 }
 0x1ed   :  { %v279_v1 = vsel %vm196_vm15, %v278_v59, %v277_v34  ;;  %v390_v4 = vor.u32 4788187, %v389_v61  ;;  %v393_v12 = vcvt.s32.f32 %v386_v60 }
 0x1ee   :  { %v282_v3 = vsel %vm1053_vm0, %v955_v5, %v279_v1 }
 0x1ef   :  { %731 = vcosq.f32 %v282_v3  ;;  %v391_v8 = vand.u32 2147483647, %v390_v4 }
 0x1f0   :  { %733 = vsinq.f32 %v282_v3 }
 0x1f1   :  { %v394_v13 = vmul.f32 %v393_v12, %v391_v8 }
 0x1f3   :  { %v395_v14 = vxor.u32 2147483648, %v394_v13 }
 0x1f5   :  { %v396_v17 = vsel %vm313_vm1, %v395_v14, %v394_v13 }
 0x1f6   :  { %v399_v19 = vsel %vm1067_vm2, %v957_v6, %v396_v17  ;;  %v598_v6 = vld [vmem:[%s1107_s8] ss:$0 sm:$0xff] }
 0x1f7   :  { %735 = vcosq.f32 %v399_v19 }
 0x1f8   :  { %737 = vsinq.f32 %v399_v19 }
 0x1f9   :  { %739 = vrcp.f32 %v444_v20 }
 0x1fc   :  { %v732_v41 = vpop.eup %731 }
 0x1fd   :  { %v734_v36 = vpop.eup %733  ;;  %v294_v26 = vxor.u32 2147483648, %v732_v41 }
 0x1fe   :  { %v291_v28 = vxor.u32 2147483648, %v734_v36 }
 0x1ff   :  { %v295_v40 = vsel %vm293_vm4, %v294_v26, %v734_v36 }
 0x200   :  { %v292_v38 = vsel %vm290_vm3, %v732_v41, %v291_v28 }
 0x201   :  { %v296_v44 = vsel %vm289_vm5, %v292_v38, %v295_v40 }
 0x202   :  { %v297_v50 = vsel %vm286_vm6, nan, %v296_v44 }
 0x203   :  { %v302_v39 = vmul.f32 %v301_v48, %v297_v50 }
 0x204   :  { %v736_v46 = vpop.eup %735 }
 0x205   :  { %v738_v33 = vpop.eup %737  ;;  %v410_v22 = vxor.u32 2147483648, %v736_v46 }
 0x206   :  { %v407_v51 = vxor.u32 2147483648, %v738_v33  ;;  %v740_v45 = vpop.eup %739 }
 0x207   :  { %v411_v52 = vsel %vm409_vm7, %v410_v22, %v738_v33  ;;  %v447_v57 = vmul.f32 %v740_v45, %v595_v29 }
 0x208   :  { %v408_v0 = vsel %vm406_vm8, %v736_v46, %v407_v51 }
 0x209   :  { %v412_v5 = vsel %vm405_vm9, %v408_v0, %v411_v52  ;;  %v452_v58 = vmul.f32 %v451_v24, %v447_v57 }
 0x20a   :  { %v413_v35 = vsel %vm403_vm10, nan, %v412_v5 }
 0x20b   :  { %v418_v47 = vmul.f32 %v417_v53, %v413_v35 }
 0x20d   :  { %v419_v25 = vadd.f32 %v418_v47, %v302_v39 }
 0x20f   :  { %v433_v42 = vadd.f32 %v1013_v62, %v419_v25 }
 0x211   :  { %v453_v49 = vadd.f32 %v452_v58, %v433_v42 }
 0x213   :  { %v468_v34 = vadd.f32 %v973_v27, %v453_v49 }
 0x215   :  { %702 = vmatmul.mubr.f32.vlgmr.msra.gmra.mxu1 %v468_v34 }
 0x2d5   :  { %v558_v54 = vpop.f32.mrf.mxu1 }
 0x2d6   :  { %v559_v31 = vadd.f32 %v598_v6, %v558_v54 }
 0x2d7   :  { %v703_v29 = vpop.f32.mrf.mxu1 }
 0x2d8   :  { %v599_v30 = vclamps-f32 %v559_v31, 100.0 }
 0x2da   :  { %564 = vst [vmem:[#allocation7] sm:$0xff] %v599_v30 }
 0x2db   :  { %792 = shalt.err (!%p789_p0)
}
 0x2dc   :  { %574 = dma.vmem_to_hbm [thread:$0]  %s572_s28, 128, %s1108_s9, [#allocation4]  }
 0x2dd   :  { %805 = dma.done.wait [#allocation4], 128  }
 0x2de   :  { %806 = vsyncadd [#allocation4], 4294967168 }
 0x2df   :  { %578 = vsyncpa [#allocation3], 1 }
 0x2e0   :  { %579 = vsyncpa [#allocation6], 1 }
 0x2e1   :  { %580 = vsyncpa [#allocation4], 1 }

</bundles_post_ra>
